<compile_context>
chip_gen: v6e
topology: v6e:2x2x1
jax: 0.10.0
libtpu: 0.0.40
codegen_flags: <defaults>
</compile_context>

<pallas_src>
import functools

import numpy as np
import jax
import jax.numpy as jnp
from jax.experimental import pallas as pl
from jax.experimental.pallas import tpu as pltpu


def _sublane_granule(dtype):
    itemsize = jnp.dtype(dtype).itemsize
    return 8 * max(1, 4 // itemsize)  # f32: 8, bf16: 16, int8/fp8: 32


@functools.lru_cache(maxsize=None)
def _tpu_caps():
    """(vmem_capacity_bytes, native_bf16_vpu) with safe fallbacks."""
    capacity = 64 << 20  # conservative default: fits every generation (v7x has 64 MiB/TC)
    try:
        capacity = int(pltpu.get_tpu_info().vmem_capacity_bytes)
    except Exception:
        pass
    capacity = int(min(max(capacity, 32 << 20), 256 << 20))
    native_bf16 = False
    try:
        kind = jax.devices()[0].device_kind.lower()
        # bf16 VALU exists on v6e and newer; v2-v5 need the f32 upcast path.
        native_bf16 = not any(t in kind for t in ("v2", "v3", "v4", "v5"))
    except Exception:
        native_bf16 = False
    return capacity, native_bf16


def _choose_tiles(rows, cols, itemsize, sublane, budget):
    """Largest (tr, tc) block per array under `budget` bytes, (8,128)-legal."""
    strip = sublane * itemsize  # bytes per column of one sublane-granule row strip
    if cols * strip <= budget:
        tc = cols  # full rows: fully contiguous HBM DMA, widest store
    else:
        tc = max(128, ((budget // strip) // 128) * 128)
    tr_max = budget // (tc * itemsize)
    if tr_max >= rows:
        tr = rows
    else:
        tr = max(sublane, (tr_max // sublane) * sublane)
    return tr, tc


def _split_for_multicore(tr, tc, rows, cols, sublane):
    """Never emit a single-block grid: split rows (preferred) or cols in two so
    v7x's two TensorCores both stream; one extra grid step is free on 1-TC chips."""
    if pl.cdiv(rows, tr) * pl.cdiv(cols, tc) >= 2:
        return tr, tc
    if rows > sublane:
        half = (((rows + 1) // 2) + sublane - 1) // sublane * sublane
        if half < rows:
            return half, tc
    if cols > 128:
        half_c = (((cols + 1) // 2) + 127) // 128 * 128
        if half_c < cols:
            return tr, half_c
    return tr, tc


@functools.partial(jax.jit, static_argnames=("mean", "std"))
def normalize(img, score, *, mean, std):
    """Pallas equivalent of Normalize.forward((img, score)).

    img: (C, H, W) or (N, C, H, W) float tensor.  mean/std: tuples of length C (or 1).
    Returns (normalized_image, score), matching the PyTorch module's tuple output.
    """
    # TODO(synk): `inplace=True` has no meaning for immutable JAX arrays; the op is
    # out-of-place by construction (matches inplace=False semantics).
    if not jnp.issubdtype(img.dtype, jnp.floating):
        raise TypeError(f"Input image should be a float tensor. Got {img.dtype}.")

    mean_np = np.asarray(mean, dtype=np.float32).reshape(-1)
    std_np = np.asarray(std, dtype=np.float32).reshape(-1)
    if np.any(std_np == 0.0):
        raise ValueError("std evaluated to zero, leading to division by zero.")
    inv_np = 1.0 / std_np  # host-precomputed reciprocal; kernel only multiplies

    if img.ndim == 3:
        C, H, W = img.shape
        batch = 1
    elif img.ndim == 4:
        batch, C, H, W = img.shape
    else:
        raise ValueError(f"expected 3-D or 4-D image, got shape {img.shape}")

    if mean_np.shape[0] not in (1, C) or std_np.shape[0] not in (1, C):
        raise ValueError("mean/std length must be 1 or C")
    mean_np = np.array(np.broadcast_to(mean_np, (C,)))
    inv_np = np.array(np.broadcast_to(inv_np, (C,)))

    rows = batch * C
    cols = H * W
    itemsize = jnp.dtype(img.dtype).itemsize
    sublane = _sublane_granule(img.dtype)

    capacity, native_bf16 = _tpu_caps()
    # ~8 MiB/array on 128 MiB-VMEM chips (v5e/v6e), ~4 MiB on v7x (64 MiB VMEM).
    budget = int(min(max(capacity // 16, 2 << 20), 8 << 20))

    tr, tc = _choose_tiles(rows, cols, itemsize, sublane, budget)
    tr, tc = _split_for_multicore(tr, tc, rows, cols, sublane)
    grid_r = pl.cdiv(rows, tr)
    grid_c = pl.cdiv(cols, tc)

    # Per-row mean / inv-std columns, padded to grid_r*tr rows so in-kernel
    # pl.ds slices never run out of bounds on the last (partial) row block.
    padded_rows = grid_r * tr
    param_dtype = img.dtype if (native_bf16 and img.dtype == jnp.bfloat16) else jnp.float32
    mean_rows = np.zeros((padded_rows, 1), np.float32)
    inv_rows = np.ones((padded_rows, 1), np.float32)
    mean_rows[:rows, 0] = np.tile(mean_np, batch)
    inv_rows[:rows, 0] = np.tile(inv_np, batch)
    mean2 = jnp.asarray(mean_rows, dtype=param_dtype)
    inv2 = jnp.asarray(inv_rows, dtype=param_dtype)

    x2 = img.reshape(rows, cols)  # lane-dense slab

    # Explicit VMEM budget: double-buffered (in + out) blocks + side arrays + slack,
    # capped at 3/4 of physical VMEM (needed on v5e where the scoped default is 16 MiB).
    block_bytes = tr * tc * itemsize
    side_bytes = 2 * 2 * (pl.cdiv(padded_rows, 8) * 8) * 128 * 4  # mean+inv, 2 buffers, lane-padded
    vmem_limit = 4 * block_bytes + side_bytes + (4 << 20)
    vmem_limit = int(min(max(vmem_limit, 16 << 20), (capacity * 3) // 4))

    def kernel(x_ref, mean_ref, inv_ref, out_ref):
        i = pl.program_id(0)
        r0 = i * tr
        if tr % sublane == 0:  # static Python branch; true whenever grid_r > 1
            r0 = pl.multiple_of(r0, sublane)
        m = mean_ref[pl.ds(r0, tr), :]
        s = inv_ref[pl.ds(r0, tr), :]
        # Arithmetic runs in the promoted dtype of (x, mean/inv): f32 everywhere by
        # default, native bf16 when the wrapper chose bf16 params (v6e+ only).
        out_ref[...] = ((x_ref[...] - m) * s).astype(out_ref.dtype)

    cost = pl.CostEstimate(
        flops=2 * rows * cols,
        transcendentals=0,
        bytes_accessed=2 * rows * cols * itemsize
        + 2 * padded_rows * jnp.dtype(param_dtype).itemsize,
    )

    out2 = pl.pallas_call(
        kernel,
        out_shape=jax.ShapeDtypeStruct((rows, cols), img.dtype),
        grid_spec=pltpu.PrefetchScalarGridSpec(
            num_scalar_prefetch=0,
            grid=(grid_r, grid_c),
            in_specs=[
                pl.BlockSpec((tr, tc), lambda i, j: (i, j)),
                # Constant block index -> mean / inv-std are DMA'd once and stay
                # resident; sliced per row-block inside the kernel.
                pl.BlockSpec((padded_rows, 1), lambda i, j: (0, 0)),
                pl.BlockSpec((padded_rows, 1), lambda i, j: (0, 0)),
            ],
            out_specs=pl.BlockSpec((tr, tc), lambda i, j: (i, j)),
        ),
        compiler_params=pltpu.CompilerParams(
            dimension_semantics=("parallel", "parallel"),
            vmem_limit_bytes=vmem_limit,
        ),
        cost_estimate=cost,
    )(x2, mean2, inv2)

    return out2.reshape(img.shape), score


if __name__ == "__main__":
    key = jax.random.PRNGKey(0)
    k_img, k_score = jax.random.split(key)

    N, C, H, W = 2, 4, 16, 16
    img = jax.random.normal(k_img, (N, C, H, W), dtype=jnp.float32)
    # Second tuple element is passed through untouched (e.g. a score map).
    score = jax.random.uniform(k_score, (2, H), dtype=jnp.float32)

    mean = (0.485, 0.456, 0.406, 0.5)
    std = (0.229, 0.224, 0.225, 0.25)

    out, score_out = normalize(img, score, mean=mean, std=std)
    jax.block_until_ready(out)
    jax.block_until_ready(score_out)

    # Reference: output[c] = (input[c] - mean[c]) / std[c]
    m = jnp.asarray(mean, jnp.float32).reshape(1, C, 1, 1)
    s = jnp.asarray(std, jnp.float32).reshape(1, C, 1, 1)
    ref = (img - m) / s

    assert out.shape == img.shape and out.dtype == img.dtype
    assert jnp.allclose(out, ref, atol=1e-5, rtol=1e-5), "mismatch vs reference"
    assert score_out.shape == score.shape
    assert jnp.array_equal(score_out, score)

    print("KERNEL_OK")
</pallas_src>

<mosaic_0001>
module attributes {stable_mosaic.version = 11 : i64} {
  func.func @kernel(%arg0: i32, %arg1: i32, %arg2: memref<8x128xf32, #tpu.memory_space<vmem>>, %arg3: memref<8x1xf32, #tpu.memory_space<vmem>>, %arg4: memref<8x1xf32, #tpu.memory_space<vmem>>, %arg5: memref<8x128xf32, #tpu.memory_space<vmem>>) attributes {dimension_semantics = [#tpu.dimension_semantics<parallel>, #tpu.dimension_semantics<parallel>], iteration_bounds = array<i64: 1, 2>, scalar_prefetch = 0 : i64, scratch_operands = 0 : i64, tpu.core_type = #tpu.core_type<tc>, window_params = [{transform_indices = @transform_0, window_bounds = array<i64: 8, 128>}, {pipeline_mode = #tpu.pipeline_mode<synchronous>, transform_indices = @transform_1, window_bounds = array<i64: 8, 1>}, {pipeline_mode = #tpu.pipeline_mode<synchronous>, transform_indices = @transform_2, window_bounds = array<i64: 8, 1>}, {transform_indices = @transform_3, window_bounds = array<i64: 8, 128>}]} {
    %c8_i32 = arith.constant 8 : i32
    %0 = arith.muli %arg0, %c8_i32 : i32
    %1 = tpu.assume_multiple %0, 8 : i32
    %2 = arith.index_cast %1 : i32 to index
    %c0 = arith.constant 0 : index
    %3 = vector.load %arg3[%2, %c0] : memref<8x1xf32, #tpu.memory_space<vmem>>, vector<8x1xf32>
    %4 = arith.index_cast %1 : i32 to index
    %c0_0 = arith.constant 0 : index
    %5 = vector.load %arg4[%4, %c0_0] : memref<8x1xf32, #tpu.memory_space<vmem>>, vector<8x1xf32>
    %c0_1 = arith.constant 0 : index
    %c0_2 = arith.constant 0 : index
    %6 = vector.load %arg2[%c0_1, %c0_2] : memref<8x128xf32, #tpu.memory_space<vmem>>, vector<8x128xf32>
    %7 = vector.broadcast %3 : vector<8x1xf32> to vector<8x128xf32>
    %8 = arith.subf %6, %7 : vector<8x128xf32>
    %9 = vector.broadcast %5 : vector<8x1xf32> to vector<8x128xf32>
    %10 = arith.mulf %8, %9 : vector<8x128xf32>
    %c0_3 = arith.constant 0 : index
    %c0_4 = arith.constant 0 : index
    %11 = vector.load %arg5[%c0_3, %c0_4] : memref<8x128xf32, #tpu.memory_space<vmem>>, vector<8x128xf32>
    tpu.vector_store %arg5[%c0_3, %c0_4], %10 {strides = array<i32>} : memref<8x128xf32, #tpu.memory_space<vmem>>, vector<8x128xf32>,
    return
  }
  func.func @transform_0(%arg0: i32, %arg1: i32) -> (i32, i32) {
    %c0_i32 = arith.constant 0 : i32
    return %arg0, %arg1 : i32, i32
  }
  func.func @transform_1(%arg0: i32, %arg1: i32) -> (i32, i32) {
    %c0_i32 = arith.constant 0 : i32
    %c0_i32_0 = arith.constant 0 : i32
    %c0_i32_1 = arith.constant 0 : i32
    return %c0_i32, %c0_i32_0 : i32, i32
  }
  func.func @transform_2(%arg0: i32, %arg1: i32) -> (i32, i32) {
    %c0_i32 = arith.constant 0 : i32
    %c0_i32_0 = arith.constant 0 : i32
    %c0_i32_1 = arith.constant 0 : i32
    return %c0_i32, %c0_i32_0 : i32, i32
  }
  func.func @transform_3(%arg0: i32, %arg1: i32) -> (i32, i32) {
    %c0_i32 = arith.constant 0 : i32
    return %arg0, %arg1 : i32, i32
  }
}

</mosaic_0001>

<bundles_post_ra>
// kernel: normalize.1
= control target key start
LH: loop header
LB: loop body
LE: loop exit
PB: predicated region body
PF: predicated region fallthrough
CT: control target
= control target key end

     0   :  { %s388_s12 = smov 0   ;;  %s390_s13 = smov 0   ;;  %s420_s0 = inlined_call_operand.vmem [shape: f32[8,256], index: 0, kind: input, shape index: {}]   ;;  %s421_s1 = inlined_call_operand.vmem [shape: f32[8,1], index: 1, kind: input, shape index: {}]   ;;  %s422_s2 = inlined_call_operand.vmem [shape: f32[8,1], index: 2, kind: input, shape index: {}]   ;;  %s423_s3 = inlined_call_operand.vmem [shape: f32[8,256], index: 3, kind: output, shape index: {}]  }
   0x1   :  { %s392_s14 = smov 0  }
   0x2 LB: > { %s22_s15 = sadd.s32 1, %s361_s13  ;;  %p312_p0 = scmp.ge.s32.totalorder %s365_s14, 1  ;;  %s365_s14 = sphi %s392_s14, %s13_s14   ;;  %s361_s13 = sphi %s390_s13, %s425_s13   ;;  %s357_s12 = sphi %s388_s12, %s424_s12  }
   0x3   : > { %p23_p1 = scmp.ge.s32.totalorder %s22_s15, 2  ;;  %p156_p2 = scmp.lt.s32.totalorder %s365_s14, 3 }
   0x5   : > { %s427_s15 = smov (%p23_p1, %s22_s15), 0  ;;  %p157_p3 = pnand %p312_p0, %p156_p2 }
   0x6   : > { %p188_p4 = scmp.lt.s32.totalorder (!%p157_p3), %s357_s12, 1 }
   0x7   : > { %160 = sbr.rel (%p157_p3) target bundleno = 145 (0x91), region = 32 }
   0xc   : > { %v204_v0 = vld [vmem:[%s421_s1] sm:$0xff]  ;;  %v367_v1 = vmov 0   ;;  %s429_s12 = smov (!%p188_p4, %s357_s12), 1 }
   0xd   : > { %342 = vset.pattern.permute.xlu0 %v367_v1  ;;  %v206_v2 = vld [vmem:[%s422_s2] sm:$0xff]  ;;  %s313_s20 = sshll.u32 %s429_s12, 3 }
   0xe   : > { %210 = vperm.xlu0 %342, %v204_v0   ;;  %s193_s23 = scalar_lea.vmem %s420_s0, %s313_s20  ;;  %s201_s26 = scalar_lea.vmem %s423_s3, %s313_s20 }
   0xf   : > { %v207_v4 = vld [vmem:[%s193_s23] sm:$0xff] }
  0x12   : > { %216 = vperm.xlu0 %342, %v206_v2  }
  0x89   : > { %v211_v3 = vpop.permute.xlu0 %210 }
  0x8a   : > { %v213_v5 = vsub.f32 %v207_v4, %v211_v3 }
  0x8d   : > { %v217_v6 = vpop.permute.xlu0 %216 }
  0x8e   : > { %v219_v7 = vmul.f32 %v217_v6, %v213_v5 }
  0x90   : > { %220 = vst [vmem:[%s201_s26] sm:$0xff] %v219_v7 }
  0x91 PF: > { %s13_s14 = sadd.s32 1, %s365_s14   ;;  %s424_s12 = smov %s361_s13 }
  0x92   : > { %p10_p5 = scmp.ge.s32.totalorder %s13_s14, 4   ;;  %s425_s13 = smov %s427_s15 }
  0x94   :  { %12 = sbr.rel (!%p10_p5) target bundleno = 2 (0x2), region = 64 }

</bundles_post_ra>
